<compile_context>
chip_gen: v6e
topology: v6e:2x2x1
jax: 0.10.0
libtpu: 0.0.40
codegen_flags: <defaults>
</compile_context>

<pallas_src>
import functools

import jax
import jax.numpy as jnp
from jax.experimental import pallas as pl
from jax.experimental.pallas import tpu as pltpu


def _sigmoid_via_tanh(x):
    # sigmoid(x) = 0.5*tanh(0.5*x) + 0.5 : a single EUP op per gate (vs exp +
    # reciprocal), relieving the single EUP bundle slot (binding on v5e once the
    # activation DMA is hidden).
    return 0.5 * jnp.tanh(0.5 * x) + 0.5


def _cell_math(x, h0, c0, w_x_ref, w_hh_ref, b_gates_ref, w_lin_h_ref, b_lin_ref):
    """Fused LSTM cell + Linear for one step on one batch tile.

    x: (TB, In) any float; h0: (TB, H) bf16; c0: (TB, H) f32.
    Returns (out f32, h1 f32, c1 f32).
    """
    H = c0.shape[-1]

    # MXU matmuls: bf16 operands, f32 accumulation (native on v5e/v6e/v7x).
    xw = jnp.dot(x.astype(jnp.bfloat16), w_x_ref[...],
                 preferred_element_type=jnp.float32)              # (TB, 5H): gates_x | lin_x
    hw = jnp.dot(h0.astype(jnp.bfloat16), w_hh_ref[...],
                 preferred_element_type=jnp.float32)              # (TB, 4H)

    gates = xw[:, :4 * H] + hw + b_gates_ref[...]                 # f32; H % 128 == 0 keeps slices lane-aligned
    lin_x = xw[:, 4 * H:]                                         # (TB, H)

    i_g = _sigmoid_via_tanh(gates[:, 0 * H:1 * H])
    f_g = _sigmoid_via_tanh(gates[:, 1 * H:2 * H])
    g_g = jnp.tanh(gates[:, 2 * H:3 * H])
    o_g = _sigmoid_via_tanh(gates[:, 3 * H:4 * H])

    c1 = f_g * c0 + i_g * g_g
    h1 = o_g * jnp.tanh(c1)

    out = (lin_x
           + jnp.dot(h1.astype(jnp.bfloat16), w_lin_h_ref[...],
                     preferred_element_type=jnp.float32)
           + b_lin_ref[...])
    return out, h1, c1


def _memory_step_kernel(x_ref, h0_ref, c0_ref,
                        w_x_ref, w_hh_ref, b_gates_ref, w_lin_h_ref, b_lin_ref,
                        out_ref, h1_ref, c1_ref):
    out, h1, c1 = _cell_math(x_ref[...], h0_ref[...], c0_ref[...],
                             w_x_ref, w_hh_ref, b_gates_ref, w_lin_h_ref, b_lin_ref)
    out_ref[...] = out.astype(out_ref.dtype)
    h1_ref[...] = h1.astype(h1_ref.dtype)
    c1_ref[...] = c1.astype(c1_ref.dtype)


def _memory_rollout_kernel(xs_ref, h0_ref, c0_ref,
                           w_x_ref, w_hh_ref, b_gates_ref, w_lin_h_ref, b_lin_ref,
                           out_ref, hT_ref, cT_ref,
                           h_sc, c_sc):
    """T timesteps fused in one call: grid axis 1 is time (sequential), weights
    are grid-invariant (DMA'd once), h/c carried in VMEM scratch."""
    t = pl.program_id(1)

    @pl.when(t == 0)
    def _():
        h_sc[...] = h0_ref[...]
        c_sc[...] = c0_ref[...]

    out, h1, c1 = _cell_math(xs_ref[0], h_sc[...], c_sc[...],
                             w_x_ref, w_hh_ref, b_gates_ref, w_lin_h_ref, b_lin_ref)

    out_ref[0] = out.astype(out_ref.dtype)
    h_sc[...] = h1.astype(h_sc.dtype)
    c_sc[...] = c1

    @pl.when(t == pl.num_programs(1) - 1)
    def _():
        hT_ref[...] = h_sc[...]
        cT_ref[...] = c_sc[...]


def prepare_params(params, input_size):
    """One-time conversion of PyTorch-layout params into kernel layout (at init,
    not per call): removes per-call transpose/concat/cast ops, pre-sums the two
    LSTM biases and stores weights in bf16 (halves weight HBM traffic)."""
    In = input_size
    w_lin = params["w_lin"]                                    # (H, H+In), PyTorch Linear layout
    return {
        # x-side fused weight: [W_ih^T | W_lin_x^T] -> (In, 4H + H)
        "w_x": jnp.concatenate([params["w_ih"].T, w_lin[:, :In].T],
                               axis=1).astype(jnp.bfloat16),
        "w_hh": params["w_hh"].T.astype(jnp.bfloat16),          # (H, 4H)
        "b_gates": (params["b_ih"] + params["b_hh"])[None, :].astype(jnp.float32),  # (1, 4H)
        "w_lin_h": w_lin[:, In:].T.astype(jnp.bfloat16),        # (H, H)
        "b_lin": params["b_lin"][None, :].astype(jnp.float32),  # (1, H)
    }


def _pick_block_b(B, block_b=None):
    if block_b is not None:
        return block_b
    if B <= 128:
        return B                         # single grid step, no tiling overhead
    # >= 2 grid steps so v7x's two TensorCores both get work; cap at 1024 rows
    # (measured mem-bound tiling: 512+ rows ~85% of HBM roofline vs ~63% at 256).
    bb = min(1024, -(-B // 2))
    return -(-bb // 8) * 8               # sublane-aligned tile


def _weight_bytes(kparams):
    return sum(int(v.size) * v.dtype.itemsize for v in kparams.values())


def _vmem_limit_bytes(block_b, In, H, x_bytes, out_bytes, kparams):
    # Double-buffered activations + double-buffered (small) weights + slack.
    per_row = In * x_bytes + H * (2 + 4 + out_bytes + 2 + 4)   # x | h0,c0 | out,h1,c1
    est = 2 * block_b * per_row + 2 * _weight_bytes(kparams) + (2 << 20)
    # Explicit limit: v5e defaults to 16 MiB scoped; clamp below v7x's 64 MiB physical.
    return int(min(max(est, 32 << 20), 48 << 20))


def memory_forward(x, h0, c0, kparams, *, block_b=None, out_dtype=jnp.bfloat16):
    """Single rollout step (masks=None path).

    x: (B, In); h0: (1, B, H) (bf16 preferred); c0: (1, B, H) f32 (num_layers=1).
    Returns (out (B, H), (h1 (1,B,H) bf16, c1 (1,B,H) f32)).
    For a genuinely in-place state update use `memory_step` (jit + donation).
    """
    B, In = x.shape
    H = h0.shape[-1]
    h0_2d = h0.reshape(B, H).astype(jnp.bfloat16)   # no-op if caller keeps h in bf16
    c0_2d = c0.reshape(B, H).astype(jnp.float32)

    bb = _pick_block_b(B, block_b)
    grid = (pl.cdiv(B, bb),)
    row = lambda i: (i, 0)        # batch-tiled operands
    whole = lambda i: (0, 0)      # weights: resident, same block every step

    grid_spec = pltpu.PrefetchScalarGridSpec(
        num_scalar_prefetch=0,
        grid=grid,
        in_specs=[
            pl.BlockSpec((bb, In), row),           # x
            pl.BlockSpec((bb, H), row),            # h0 (bf16)
            pl.BlockSpec((bb, H), row),            # c0 (f32)
            pl.BlockSpec((In, 5 * H), whole),      # w_x  (bf16)
            pl.BlockSpec((H, 4 * H), whole),       # w_hh (bf16)
            pl.BlockSpec((1, 4 * H), whole),       # b_gates (f32)
            pl.BlockSpec((H, H), whole),           # w_lin_h (bf16)
            pl.BlockSpec((1, H), whole),           # b_lin (f32)
        ],
        out_specs=(
            pl.BlockSpec((bb, H), row),            # out
            pl.BlockSpec((bb, H), row),            # h1 (bf16)
            pl.BlockSpec((bb, H), row),            # c1 (f32)
        ),
    )

    x_bytes = x.dtype.itemsize
    out_bytes = jnp.dtype(out_dtype).itemsize
    cost = pl.CostEstimate(
        flops=int(2 * B * (In * 5 * H + H * 4 * H + H * H)),
        transcendentals=int(5 * B * H),
        bytes_accessed=int(B * (In * x_bytes + H * (2 + 4 + out_bytes + 2 + 4))
                           + _weight_bytes(kparams)),
    )

    out, h1, c1 = pl.pallas_call(
        _memory_step_kernel,
        out_shape=(
            jax.ShapeDtypeStruct((B, H), out_dtype),
            jax.ShapeDtypeStruct((B, H), jnp.bfloat16),
            jax.ShapeDtypeStruct((B, H), jnp.float32),
        ),
        grid_spec=grid_spec,
        # Recurrent state updated in place (h1 over h0, c1 over c0); effective
        # only when the caller donates (see `memory_step`).
        input_output_aliases={1: 1, 2: 2},
        compiler_params=pltpu.CompilerParams(
            dimension_semantics=("parallel",),
            vmem_limit_bytes=_vmem_limit_bytes(bb, In, H, x_bytes, out_bytes, kparams),
        ),
        cost_estimate=cost,
    )(x, h0_2d, c0_2d, kparams["w_x"], kparams["w_hh"], kparams["b_gates"],
      kparams["w_lin_h"], kparams["b_lin"])

    return out, (h1[None], c1[None])


# Jit boundary with buffer donation so input_output_aliases is genuinely in place
# (without donation XLA inserts defensive copies of h/c every step).
memory_step = jax.jit(memory_forward, donate_argnums=(1, 2))


def memory_forward_rollout(xs, h0, c0, kparams, *, block_b=None, out_dtype=jnp.bfloat16):
    """T consecutive rollout steps fused in one pallas_call.

    xs: (T, B, In); h0/c0: (1, B, H). Equivalent to calling memory_forward T
    times; weights are DMA'd once per call instead of once per step (the
    dominant cost at small B).
    Returns (outs (T, B, H), (hT (1,B,H) bf16, cT (1,B,H) f32)).
    """
    T, B, In = xs.shape
    H = h0.shape[-1]
    h0_2d = h0.reshape(B, H).astype(jnp.bfloat16)
    c0_2d = c0.reshape(B, H).astype(jnp.float32)

    bb = _pick_block_b(B, block_b)
    grid = (pl.cdiv(B, bb), T)   # time innermost (sequential recurrence), batch parallel

    grid_spec = pltpu.PrefetchScalarGridSpec(
        num_scalar_prefetch=0,
        grid=grid,
        in_specs=[
            pl.BlockSpec((1, bb, In), lambda b, t: (t, b, 0)),   # xs step t
            pl.BlockSpec((bb, H), lambda b, t: (b, 0)),          # h0
            pl.BlockSpec((bb, H), lambda b, t: (b, 0)),          # c0
            pl.BlockSpec((In, 5 * H), lambda b, t: (0, 0)),      # w_x
            pl.BlockSpec((H, 4 * H), lambda b, t: (0, 0)),       # w_hh
            pl.BlockSpec((1, 4 * H), lambda b, t: (0, 0)),       # b_gates
            pl.BlockSpec((H, H), lambda b, t: (0, 0)),           # w_lin_h
            pl.BlockSpec((1, H), lambda b, t: (0, 0)),           # b_lin
        ],
        out_specs=(
            pl.BlockSpec((1, bb, H), lambda b, t: (t, b, 0)),    # outs
            pl.BlockSpec((bb, H), lambda b, t: (b, 0)),          # hT
            pl.BlockSpec((bb, H), lambda b, t: (b, 0)),          # cT
        ),
        scratch_shapes=[
            pltpu.VMEM((bb, H), jnp.bfloat16),                   # h carry
            pltpu.VMEM((bb, H), jnp.float32),                    # c carry
        ],
    )

    x_bytes = xs.dtype.itemsize
    out_bytes = jnp.dtype(out_dtype).itemsize

    outs, hT, cT = pl.pallas_call(
        _memory_rollout_kernel,
        out_shape=(
            jax.ShapeDtypeStruct((T, B, H), out_dtype),
            jax.ShapeDtypeStruct((B, H), jnp.bfloat16),
            jax.ShapeDtypeStruct((B, H), jnp.float32),
        ),
        grid_spec=grid_spec,
        input_output_aliases={1: 1, 2: 2},
        compiler_params=pltpu.CompilerParams(
            dimension_semantics=("parallel", "arbitrary"),
            vmem_limit_bytes=_vmem_limit_bytes(bb, In, H, x_bytes, out_bytes, kparams),
        ),
    )(xs, h0_2d, c0_2d, kparams["w_x"], kparams["w_hh"], kparams["b_gates"],
      kparams["w_lin_h"], kparams["b_lin"])

    return outs, (hT[None], cT[None])


def init_params(key, input_size, hidden_size):
    """Deterministic init mimicking PyTorch's U(-1/sqrt(H), 1/sqrt(H)) (PyTorch layout)."""
    ks = jax.random.split(key, 6)
    s = 1.0 / jnp.sqrt(hidden_size)
    return {
        "w_ih": jax.random.uniform(ks[0], (4 * hidden_size, input_size), jnp.float32, -s, s),
        "w_hh": jax.random.uniform(ks[1], (4 * hidden_size, hidden_size), jnp.float32, -s, s),
        "b_ih": jax.random.uniform(ks[2], (4 * hidden_size,), jnp.float32, -s, s),
        "b_hh": jax.random.uniform(ks[3], (4 * hidden_size,), jnp.float32, -s, s),
        "w_lin": jax.random.uniform(ks[4], (hidden_size, hidden_size + input_size), jnp.float32, -s, s),
        "b_lin": jax.random.uniform(ks[5], (hidden_size,), jnp.float32, -s, s),
    }


def memory_forward_ref(x, h0, c0, p):
    """Pure-JAX f32 reference mirroring torch.nn.LSTM (1 step) + Linear."""
    H = h0.shape[-1]
    with jax.default_matmul_precision("highest"):
        gates = x @ p["w_ih"].T + p["b_ih"] + h0[0] @ p["w_hh"].T + p["b_hh"]
        i = jax.nn.sigmoid(gates[:, :H])
        f = jax.nn.sigmoid(gates[:, H:2 * H])
        g = jnp.tanh(gates[:, 2 * H:3 * H])
        o = jax.nn.sigmoid(gates[:, 3 * H:])
        c1 = f * c0[0] + i * g
        h1 = o * jnp.tanh(c1)
        out = jnp.concatenate([x, h1], axis=-1) @ p["w_lin"].T + p["b_lin"]
    return out, (h1[None], c1[None])


def memory_rollout_ref(xs, h0, c0, p):
    outs = []
    h, c = h0, c0
    for t in range(xs.shape[0]):
        o, (h, c) = memory_forward_ref(xs[t], h, c, p)
        outs.append(o)
    return jnp.stack(outs), (h, c)


if __name__ == "__main__":
    # Small shapes consistent with the module (module default H=256; H kept a
    # multiple of 128 so the fused gate/lin slices stay lane-aligned).
    B, In, H, T = 8, 32, 128, 4
    key = jax.random.PRNGKey(0)
    kx, kxs, kh, kc, kp = jax.random.split(key, 5)

    x = jax.random.normal(kx, (B, In), jnp.float32)
    xs = jax.random.normal(kxs, (T, B, In), jnp.float32)
    # Recurrent hidden state is kept in bf16 end-to-end (HBM-traffic lever);
    # cell state stays f32 to contain drift over long rollouts.
    h0 = jax.random.normal(kh, (1, B, H), jnp.float32).astype(jnp.bfloat16)
    c0 = jax.random.normal(kc, (1, B, H), jnp.float32)

    params = init_params(kp, In, H)            # PyTorch-layout params
    kparams = prepare_params(params, In)       # one-time kernel layout (bf16 weights)

    h0_f32 = h0.astype(jnp.float32)

    # f32 references first (the single-step kernel call donates h0/c0).
    out_r, (h1_r, c1_r) = memory_forward_ref(x, h0_f32, c0, params)
    outs_r, (hT_r, cT_r) = memory_rollout_ref(xs, h0_f32, c0, params)

    # Multi-step rollout kernel (weights DMA'd once for all T steps).
    outs, (hT, cT) = memory_forward_rollout(xs, h0, c0, kparams)
    jax.block_until_ready((outs, hT, cT))

    # Single-step kernel, in-place state update via jit + donation (call last:
    # h0/c0 buffers are donated).
    out, (h1, c1) = memory_step(x, h0, c0, kparams)
    jax.block_until_ready((out, h1, c1))

    # bf16 weights / bf16 hidden state into the MXU -> loosen tolerance vs f32 ref.
    def _check(name, got, want, tol):
        got = got.astype(jnp.float32)
        assert jnp.allclose(got, want, atol=tol, rtol=tol), \
            f"{name} mismatch, max abs diff {jnp.max(jnp.abs(got - want))}"

    _check("out", out, out_r, 5e-2)
    _check("h1", h1, h1_r, 5e-2)
    _check("c1", c1, c1_r, 5e-2)
    # Error compounds slightly over T recurrent steps with a bf16 hidden state.
    _check("rollout outs", outs, outs_r, 1e-1)
    _check("rollout hT", hT, hT_r, 1e-1)
    _check("rollout cT", cT, cT_r, 1e-1)

    # TODO(synk): batch_mode path (masks + unpad_trajectories over padded
    # trajectories) is training-time glue; only the rollout (masks=None)
    # single-step / fused-rollout paths are implemented as kernels here.
    print("KERNEL_OK")
</pallas_src>

<mosaic_0001>
module attributes {stable_mosaic.version = 11 : i64} {
  func.func @_memory_rollout_kernel(%arg0: i32, %arg1: i32, %arg2: memref<1x8x32xf32, #tpu.memory_space<vmem>>, %arg3: memref<8x128xbf16, #tpu.memory_space<vmem>>, %arg4: memref<8x128xf32, #tpu.memory_space<vmem>>, %arg5: memref<32x640xbf16, #tpu.memory_space<vmem>>, %arg6: memref<128x512xbf16, #tpu.memory_space<vmem>>, %arg7: memref<1x512xf32, #tpu.memory_space<vmem>>, %arg8: memref<128x128xbf16, #tpu.memory_space<vmem>>, %arg9: memref<1x128xf32, #tpu.memory_space<vmem>>, %arg10: memref<1x8x128xbf16, #tpu.memory_space<vmem>>, %arg11: memref<8x128xbf16, #tpu.memory_space<vmem>>, %arg12: memref<8x128xf32, #tpu.memory_space<vmem>>, %arg13: memref<8x128xbf16, #tpu.memory_space<vmem>>, %arg14: memref<8x128xf32, #tpu.memory_space<vmem>>) attributes {dimension_semantics = [#tpu.dimension_semantics<parallel>, #tpu.dimension_semantics<arbitrary>], iteration_bounds = array<i64: 1, 4>, scalar_prefetch = 0 : i64, scratch_operands = 2 : i64, tpu.core_type = #tpu.core_type<tc>, window_params = [{transform_indices = @transform_0, window_bounds = array<i64: 1, 8, 32>}, {transform_indices = @transform_1, window_bounds = array<i64: 8, 128>}, {transform_indices = @transform_2, window_bounds = array<i64: 8, 128>}, {pipeline_mode = #tpu.pipeline_mode<synchronous>, transform_indices = @transform_3, window_bounds = array<i64: 32, 640>}, {pipeline_mode = #tpu.pipeline_mode<synchronous>, transform_indices = @transform_4, window_bounds = array<i64: 128, 512>}, {pipeline_mode = #tpu.pipeline_mode<synchronous>, transform_indices = @transform_5, window_bounds = array<i64: 1, 512>}, {pipeline_mode = #tpu.pipeline_mode<synchronous>, transform_indices = @transform_6, window_bounds = array<i64: 128, 128>}, {pipeline_mode = #tpu.pipeline_mode<synchronous>, transform_indices = @transform_7, window_bounds = array<i64: 1, 128>}, {transform_indices = @transform_8, window_bounds = array<i64: 1, 8, 128>}, {transform_indices = @transform_9, window_bounds = array<i64: 8, 128>}, {transform_indices = @transform_10, window_bounds = array<i64: 8, 128>}]} {
    %c0_i32 = arith.constant 0 : i32
    %0 = arith.cmpi eq, %arg1, %c0_i32 : i32
    %1 = arith.extui %0 : i1 to i32
    %c0_i32_0 = arith.constant 0 : i32
    %2 = arith.cmpi ne, %1, %c0_i32_0 : i32
    scf.if %2 {
      %c0_36 = arith.constant 0 : index
      %c0_37 = arith.constant 0 : index
      %66 = vector.load %arg3[%c0_36, %c0_37] : memref<8x128xbf16, #tpu.memory_space<vmem>>, vector<8x128xbf16>
      %c0_38 = arith.constant 0 : index
      %c0_39 = arith.constant 0 : index
      %67 = vector.load %arg13[%c0_38, %c0_39] : memref<8x128xbf16, #tpu.memory_space<vmem>>, vector<8x128xbf16>
      tpu.vector_store %arg13[%c0_38, %c0_39], %66 {strides = array<i32>} : memref<8x128xbf16, #tpu.memory_space<vmem>>, vector<8x128xbf16>,
      %c0_40 = arith.constant 0 : index
      %c0_41 = arith.constant 0 : index
      %68 = vector.load %arg4[%c0_40, %c0_41] : memref<8x128xf32, #tpu.memory_space<vmem>>, vector<8x128xf32>
      %c0_42 = arith.constant 0 : index
      %c0_43 = arith.constant 0 : index
      %69 = vector.load %arg14[%c0_42, %c0_43] : memref<8x128xf32, #tpu.memory_space<vmem>>, vector<8x128xf32>
      tpu.vector_store %arg14[%c0_42, %c0_43], %68 {strides = array<i32>} : memref<8x128xf32, #tpu.memory_space<vmem>>, vector<8x128xf32>,
    } else {
    }
    %c0 = arith.constant 0 : index
    %c0_1 = arith.constant 0 : index
    %c0_2 = arith.constant 0 : index
    %3 = vector.load %arg2[%c0, %c0_1, %c0_2] : memref<1x8x32xf32, #tpu.memory_space<vmem>>, vector<1x8x32xf32>
    %4 = vector.shape_cast %3 : vector<1x8x32xf32> to vector<8x32xf32>
    %c0_3 = arith.constant 0 : index
    %c0_4 = arith.constant 0 : index
    %5 = vector.load %arg13[%c0_3, %c0_4] : memref<8x128xbf16, #tpu.memory_space<vmem>>, vector<8x128xbf16>
    %c0_5 = arith.constant 0 : index
    %c0_6 = arith.constant 0 : index
    %6 = vector.load %arg14[%c0_5, %c0_6] : memref<8x128xf32, #tpu.memory_space<vmem>>, vector<8x128xf32>
    %7 = arith.truncf %4 : vector<8x32xf32> to vector<8x32xbf16>
    %c0_7 = arith.constant 0 : index
    %c0_8 = arith.constant 0 : index
    %8 = vector.load %arg5[%c0_7, %c0_8] : memref<32x640xbf16, #tpu.memory_space<vmem>>, vector<32x640xbf16>
    %cst = arith.constant dense<0.000000e+00> : vector<8x640xf32>
    %9 = tpu.matmul %7, %8, %cst {dimension_numbers = #tpu.dot_dimension_numbers<[1], [0], [0], [1], [0, 0, 1, 1], [], []>} : vector<8x32xbf16>, vector<32x640xbf16>, vector<8x640xf32> -> vector<8x640xf32>
    %c0_9 = arith.constant 0 : index
    %c0_10 = arith.constant 0 : index
    %10 = vector.load %arg6[%c0_9, %c0_10] : memref<128x512xbf16, #tpu.memory_space<vmem>>, vector<128x512xbf16>
    %cst_11 = arith.constant dense<0.000000e+00> : vector<8x512xf32>
    %11 = tpu.matmul %5, %10, %cst_11 {dimension_numbers = #tpu.dot_dimension_numbers<[1], [0], [0], [1], [0, 0, 1, 1], [], []>} : vector<8x128xbf16>, vector<128x512xbf16>, vector<8x512xf32> -> vector<8x512xf32>
    %12 = vector.extract_strided_slice %9 {offsets = [0, 0], sizes = [8, 512], strides = [1, 1]} : vector<8x640xf32> to vector<8x512xf32>
    %13 = arith.addf %12, %11 : vector<8x512xf32>
    %c0_12 = arith.constant 0 : index
    %c0_13 = arith.constant 0 : index
    %14 = vector.load %arg7[%c0_12, %c0_13] : memref<1x512xf32, #tpu.memory_space<vmem>>, vector<1x512xf32>
    %15 = vector.broadcast %14 : vector<1x512xf32> to vector<8x512xf32>
    %16 = arith.addf %13, %15 : vector<8x512xf32>
    %17 = vector.extract_strided_slice %9 {offsets = [0, 512], sizes = [8, 128], strides = [1, 1]} : vector<8x640xf32> to vector<8x128xf32>
    %18 = vector.extract_strided_slice %16 {offsets = [0, 0], sizes = [8, 128], strides = [1, 1]} : vector<8x512xf32> to vector<8x128xf32>
    %cst_14 = arith.constant 5.000000e-01 : f32
    %19 = vector.broadcast %cst_14 : f32 to vector<8x128xf32>
    %20 = arith.mulf %19, %18 : vector<8x128xf32>
    %21 = math.tanh %20 : vector<8x128xf32>
    %cst_15 = arith.constant 5.000000e-01 : f32
    %22 = vector.broadcast %cst_15 : f32 to vector<8x128xf32>
    %23 = arith.mulf %22, %21 : vector<8x128xf32>
    %cst_16 = arith.constant 5.000000e-01 : f32
    %24 = vector.broadcast %cst_16 : f32 to vector<8x128xf32>
    %25 = arith.addf %23, %24 : vector<8x128xf32>
    %26 = vector.extract_strided_slice %16 {offsets = [0, 128], sizes = [8, 128], strides = [1, 1]} : vector<8x512xf32> to vector<8x128xf32>
    %cst_17 = arith.constant 5.000000e-01 : f32
    %27 = vector.broadcast %cst_17 : f32 to vector<8x128xf32>
    %28 = arith.mulf %27, %26 : vector<8x128xf32>
    %29 = math.tanh %28 : vector<8x128xf32>
    %cst_18 = arith.constant 5.000000e-01 : f32
    %30 = vector.broadcast %cst_18 : f32 to vector<8x128xf32>
    %31 = arith.mulf %30, %29 : vector<8x128xf32>
    %cst_19 = arith.constant 5.000000e-01 : f32
    %32 = vector.broadcast %cst_19 : f32 to vector<8x128xf32>
    %33 = arith.addf %31, %32 : vector<8x128xf32>
    %34 = vector.extract_strided_slice %16 {offsets = [0, 256], sizes = [8, 128], strides = [1, 1]} : vector<8x512xf32> to vector<8x128xf32>
    %35 = math.tanh %34 : vector<8x128xf32>
    %36 = vector.extract_strided_slice %16 {offsets = [0, 384], sizes = [8, 128], strides = [1, 1]} : vector<8x512xf32> to vector<8x128xf32>
    %cst_20 = arith.constant 5.000000e-01 : f32
    %37 = vector.broadcast %cst_20 : f32 to vector<8x128xf32>
    %38 = arith.mulf %37, %36 : vector<8x128xf32>
    %39 = math.tanh %38 : vector<8x128xf32>
    %cst_21 = arith.constant 5.000000e-01 : f32
    %40 = vector.broadcast %cst_21 : f32 to vector<8x128xf32>
    %41 = arith.mulf %40, %39 : vector<8x128xf32>
    %cst_22 = arith.constant 5.000000e-01 : f32
    %42 = vector.broadcast %cst_22 : f32 to vector<8x128xf32>
    %43 = arith.addf %41, %42 : vector<8x128xf32>
    %44 = arith.mulf %33, %6 : vector<8x128xf32>
    %45 = arith.mulf %25, %35 : vector<8x128xf32>
    %46 = arith.addf %44, %45 : vector<8x128xf32>
    %47 = math.tanh %46 : vector<8x128xf32>
    %48 = arith.mulf %43, %47 : vector<8x128xf32>
    %49 = arith.truncf %48 : vector<8x128xf32> to vector<8x128xbf16>
    %c0_23 = arith.constant 0 : index
    %c0_24 = arith.constant 0 : index
    %50 = vector.load %arg8[%c0_23, %c0_24] : memref<128x128xbf16, #tpu.memory_space<vmem>>, vector<128x128xbf16>
    %cst_25 = arith.constant dense<0.000000e+00> : vector<8x128xf32>
    %51 = tpu.matmul %49, %50, %cst_25 {dimension_numbers = #tpu.dot_dimension_numbers<[1], [0], [0], [1], [0, 0, 1, 1], [], []>} : vector<8x128xbf16>, vector<128x128xbf16>, vector<8x128xf32> -> vector<8x128xf32>
    %52 = arith.addf %17, %51 : vector<8x128xf32>
    %c0_26 = arith.constant 0 : index
    %c0_27 = arith.constant 0 : index
    %53 = vector.load %arg9[%c0_26, %c0_27] : memref<1x128xf32, #tpu.memory_space<vmem>>, vector<1x128xf32>
    %54 = vector.broadcast %53 : vector<1x128xf32> to vector<8x128xf32>
    %55 = arith.addf %52, %54 : vector<8x128xf32>
    %56 = arith.truncf %55 : vector<8x128xf32> to vector<8x128xbf16>
    %c0_28 = arith.constant 0 : index
    %c0_29 = arith.constant 0 : index
    %c0_30 = arith.constant 0 : index
    %57 = vector.load %arg10[%c0_28, %c0_29, %c0_30] : memref<1x8x128xbf16, #tpu.memory_space<vmem>>, vector<1x8x128xbf16>
    %58 = vector.shape_cast %57 : vector<1x8x128xbf16> to vector<8x128xbf16>
    %59 = vector.shape_cast %56 : vector<8x128xbf16> to vector<1x8x128xbf16>
    tpu.vector_store %arg10[%c0_28, %c0_29, %c0_30], %59 {strides = array<i32>} : memref<1x8x128xbf16, #tpu.memory_space<vmem>>, vector<1x8x128xbf16>,
    %60 = arith.truncf %48 : vector<8x128xf32> to vector<8x128xbf16>
    %c0_31 = arith.constant 0 : index
    %c0_32 = arith.constant 0 : index
    %61 = vector.load %arg13[%c0_31, %c0_32] : memref<8x128xbf16, #tpu.memory_space<vmem>>, vector<8x128xbf16>
    tpu.vector_store %arg13[%c0_31, %c0_32], %60 {strides = array<i32>} : memref<8x128xbf16, #tpu.memory_space<vmem>>, vector<8x128xbf16>,
    %c0_33 = arith.constant 0 : index
    %c0_34 = arith.constant 0 : index
    %62 = vector.load %arg14[%c0_33, %c0_34] : memref<8x128xf32, #tpu.memory_space<vmem>>, vector<8x128xf32>
    tpu.vector_store %arg14[%c0_33, %c0_34], %46 {strides = array<i32>} : memref<8x128xf32, #tpu.memory_space<vmem>>, vector<8x128xf32>,
    %c3_i32 = arith.constant 3 : i32
    %63 = arith.cmpi eq, %arg1, %c3_i32 : i32
    %64 = arith.extui %63 : i1 to i32
    %c0_i32_35 = arith.constant 0 : i32
    %65 = arith.cmpi ne, %64, %c0_i32_35 : i32
    scf.if %65 {
      %c0_36 = arith.constant 0 : index
      %c0_37 = arith.constant 0 : index
      %66 = vector.load %arg13[%c0_36, %c0_37] : memref<8x128xbf16, #tpu.memory_space<vmem>>, vector<8x128xbf16>
      %c0_38 = arith.constant 0 : index
      %c0_39 = arith.constant 0 : index
      %67 = vector.load %arg11[%c0_38, %c0_39] : memref<8x128xbf16, #tpu.memory_space<vmem>>, vector<8x128xbf16>
      tpu.vector_store %arg11[%c0_38, %c0_39], %66 {strides = array<i32>} : memref<8x128xbf16, #tpu.memory_space<vmem>>, vector<8x128xbf16>,
      %c0_40 = arith.constant 0 : index
      %c0_41 = arith.constant 0 : index
      %68 = vector.load %arg14[%c0_40, %c0_41] : memref<8x128xf32, #tpu.memory_space<vmem>>, vector<8x128xf32>
      %c0_42 = arith.constant 0 : index
      %c0_43 = arith.constant 0 : index
      %69 = vector.load %arg12[%c0_42, %c0_43] : memref<8x128xf32, #tpu.memory_space<vmem>>, vector<8x128xf32>
      tpu.vector_store %arg12[%c0_42, %c0_43], %68 {strides = array<i32>} : memref<8x128xf32, #tpu.memory_space<vmem>>, vector<8x128xf32>,
    } else {
    }
    return
  }
  func.func @transform_0(%arg0: i32, %arg1: i32) -> (i32, i32, i32) {
    %c0_i32 = arith.constant 0 : i32
    %c0_i32_0 = arith.constant 0 : i32
    return %arg1, %arg0, %c0_i32 : i32, i32, i32
  }
  func.func @transform_1(%arg0: i32, %arg1: i32) -> (i32, i32) {
    %c0_i32 = arith.constant 0 : i32
    %c0_i32_0 = arith.constant 0 : i32
    return %arg0, %c0_i32 : i32, i32
  }
  func.func @transform_2(%arg0: i32, %arg1: i32) -> (i32, i32) {
    %c0_i32 = arith.constant 0 : i32
    %c0_i32_0 = arith.constant 0 : i32
    return %arg0, %c0_i32 : i32, i32
  }
  func.func @transform_3(%arg0: i32, %arg1: i32) -> (i32, i32) {
    %c0_i32 = arith.constant 0 : i32
    %c0_i32_0 = arith.constant 0 : i32
    %c0_i32_1 = arith.constant 0 : i32
    return %c0_i32, %c0_i32_0 : i32, i32
  }
  func.func @transform_4(%arg0: i32, %arg1: i32) -> (i32, i32) {
    %c0_i32 = arith.constant 0 : i32
    %c0_i32_0 = arith.constant 0 : i32
    %c0_i32_1 = arith.constant 0 : i32
    return %c0_i32, %c0_i32_0 : i32, i32
  }
  func.func @transform_5(%arg0: i32, %arg1: i32) -> (i32, i32) {
    %c0_i32 = arith.constant 0 : i32
    %c0_i32_0 = arith.constant 0 : i32
    %c0_i32_1 = arith.constant 0 : i32
    return %c0_i32, %c0_i32_0 : i32, i32
  }
  func.func @transform_6(%arg0: i32, %arg1: i32) -> (i32, i32) {
    %c0_i32 = arith.constant 0 : i32
    %c0_i32_0 = arith.constant 0 : i32
    %c0_i32_1 = arith.constant 0 : i32
    return %c0_i32, %c0_i32_0 : i32, i32
  }
  func.func @transform_7(%arg0: i32, %arg1: i32) -> (i32, i32) {
    %c0_i32 = arith.constant 0 : i32
    %c0_i32_0 = arith.constant 0 : i32
    %c0_i32_1 = arith.constant 0 : i32
    return %c0_i32, %c0_i32_0 : i32, i32
  }
  func.func @transform_8(%arg0: i32, %arg1: i32) -> (i32, i32, i32) {
    %c0_i32 = arith.constant 0 : i32
    %c0_i32_0 = arith.constant 0 : i32
    return %arg1, %arg0, %c0_i32 : i32, i32, i32
  }
  func.func @transform_9(%arg0: i32, %arg1: i32) -> (i32, i32) {
    %c0_i32 = arith.constant 0 : i32
    %c0_i32_0 = arith.constant 0 : i32
    return %arg0, %c0_i32 : i32, i32
  }
  func.func @transform_10(%arg0: i32, %arg1: i32) -> (i32, i32) {
    %c0_i32 = arith.constant 0 : i32
    %c0_i32_0 = arith.constant 0 : i32
    return %arg0, %c0_i32 : i32, i32
  }
}

</mosaic_0001>

<bundles_post_ra>
// kernel: tpu_custom_call.1
= control target key start
LH: loop header
LB: loop body
LE: loop exit
PB: predicated region body
PF: predicated region fallthrough
CT: control target
= control target key end

     0   :  { %s2293_s0 = inlined_call_operand.vmem [shape: f32[4,8,32], index: 0, kind: input, shape index: {}]   ;;  %s2294_s1 = inlined_call_operand.hbm [shape: bf16[8,128], index: 1, kind: input, shape index: {}, may-alias: {1,9}]   ;;  %s2295_s2 = inlined_call_operand.hbm [shape: f32[8,128], index: 2, kind: input, shape index: {}, may-alias: {2,10}]   ;;  %s2296_s3 = inlined_call_operand.hbm [shape: bf16[32,640], index: 3, kind: input, shape index: {}]   ;;  %s2297_s4 = inlined_call_operand.hbm [shape: bf16[128,512], index: 4, kind: input, shape index: {}]   ;;  %s2298_s5 = inlined_call_operand.vmem [shape: f32[1,512], index: 5, kind: input, shape index: {}]   ;;  %s2299_s6 = inlined_call_operand.hbm [shape: bf16[128,128], index: 6, kind: input, shape index: {}]   ;;  %s2300_s7 = inlined_call_operand.hbm [shape: f32[1,128], index: 7, kind: input, shape index: {}]   ;;  %s2301_s8 = inlined_call_operand.hbm [shape: bf16[4,8,128], index: 8, kind: output, shape index: {0}]   ;;  %s2302_s9 = inlined_call_operand.hbm [shape: bf16[8,128], index: 9, kind: output, shape index: {1}, may-alias: {1,9}]   ;;  %s2303_s10 = inlined_call_operand.hbm [shape: f32[8,128], index: 10, kind: output, shape index: {2}, may-alias: {2,10}]  }
   0x1   :  { %2314 = sst [smem:[#allocation30_spill]] %s2295_s2 }
   0x2   :  { %16 = vsyncpa [#allocation5], 0 }
   0x3   :  { %17 = vsyncpa [#allocation8], 0 }
   0x4   :  { %18 = vsyncpa [#allocation11], 0 }
   0x5   :  { %19 = vsyncpa [#allocation14], 0 }
   0x6   :  { %20 = vsyncpa [#allocation6], 0 }
   0x7   :  { %22 = vsyncpa [#allocation6 + $0x1], 0 }
   0x8   :  { %23 = vsyncpa [#allocation17], 0  ;;  %s2051_s13 = smov 0   ;;  %s2053_s14 = smov 0  }
   0x9   :  { %s2055_s15 = smov 0   ;;  %s2057_s16 = smov 0  }
   0xa   :  { %s2059_s17 = smov 0   ;;  %s2061_s18 = smov 0  }
   0xb LB: > { %2315 = sst [smem:[#allocation25_spill]] %s1964_s15  ;;  %s1334_s19 = sadd.s32 4294967295, %s1976_s18   ;;  %s1976_s18 = sphi %s2061_s18, %s29_s18   ;;  %s1972_s17 = sphi %s2059_s17, %s2340_s17   ;;  %s1968_s16 = sphi %s2057_s16, %s2336_s16   ;;  %s1964_s15 = sphi %s2055_s15, %s2335_s15   ;;  %s1960_s14 = sphi %s2053_s14, %s2339_s14   ;;  %s1956_s13 = sphi %s2051_s13, %s2338_s13  }
   0xc   : > { %2316 = sst [smem:[#allocation26_spill]] %s1972_s17  ;;  %s1335_s20 = sadd.s32 4294967294, %s1976_s18  }
   0xd   : > { %s38_s21 = sadd.s32 1, %s1972_s17  ;;  %s235_s22 = sadd.s32 1, %s1964_s15 }
   0xe   : > { %p39_p0 = scmp.ge.s32.totalorder %s38_s21, 4  ;;  %p245_p1 = scmp.ne.s32.totalorder %s1964_s15, %s1960_s14 }
   0xf   : > { %p2087_p2 = scmp.eq.s32.totalorder %s1334_s19, 3  ;;  %p251_p3 = scmp.ne.s32.totalorder %s1960_s14, %s1956_s13 }
  0x10   : > { %s2342_s21 = smov (%p39_p0, %s38_s21), 0  ;;  %p252_p5 = scmp.eq.s32.totalorder %s1335_s20, 3 }
  0x11   : > { %s2317_s23 = scalar_select %p2087_p2, 1, 0 }
  0x12   : > { %2318 = sst [smem:[#allocation27_spill]] %s2342_s21  ;;  %p2097_p4 = por %p2087_p2, %p245_p1 }
  0x13   : > { %s230_s25 = ssub.s32 %s1972_s17, %s2342_s21  ;;  %p1336_p6 = scmp.ge.s32.totalorder %s1976_s18, 1 }
  0x14   : > { %s2319_s24 = scalar_select %p2097_p4, 1, 0 }
  0x15   : > { %p233_p7 = scmp.eq.s32.totalorder %s230_s25, 0  ;;  %p2104_p8 = por %p252_p5, %p251_p3 }
  0x16   : > { %p311_p9 = scmp.lt.s32.totalorder %s1976_s18, 5  ;;  %p2116_p11 = scmp.eq.s32.totalorder %s1334_s19, 0 }
  0x17   : > { %s2320_s26 = scalar_select %p2104_p8, 1, 0 }
  0x18   : > { %s2110_s27 = scalar_select %p233_p7, %s1964_s15, %s235_s22  }
  0x19   : > { %2321 = sst [smem:[#allocation28_spill]] %s2320_s26  ;;  %p2112_p10 = pnand %p1336_p6, %p311_p9 }
  0x1a   : > { %2322 = sst [smem:[#allocation29_spill]] %s2110_s27  ;;  %s1978_s30 = smov [#allocation7]  }
  0x1b   : > { %s2323_s28 = scalar_select %p2112_p10, 1, 0 }
  0x1c   : > { %s2324_s29 = scalar_select %p2116_p11, 1, 0 }
  0x1d   : > { %p1491_p12 = pneg %p2112_p10  ;;  %s339_s11 = sshll.u32 %s1978_s30, 4  ;;  %s340_s11 = int_to_ptr.vmem [resolvable:$true] %s339_s11 }
  0x1e   : > { %s1979_s12 = smov [#allocation10]   ;;  %s1687_s25 = scalar_lea.vmem %s340_s11, 128 }
  0x1f   : > { %s362_s20 = sshll.u32 %s1979_s12, 4  ;;  %p2124_p13 = pnand %p2116_p11, %p1491_p12  ;;  %s363_s20 = int_to_ptr.vmem [resolvable:$true] %s362_s20 }
  0x20   : > { %p1688_p1 = scmp.ne.s32.totalorder %s340_s11, %s1687_s25  ;;  %p1695_p6 = scmp.lt.s32.totalorder %s340_s11, %s340_s11 }
  0x21   : > { %p2130_p0 = pneg %p2124_p13  ;;  %p1696_p7 = scmp.lt.s32.totalorder %s1687_s25, %s1687_s25 }
  0x23   : > { %p1690_p3 = pnand %p1688_p1, %p2130_p0  ;;  %p1697_p9 = por %p1696_p7, %p1695_p6 }
  0x25   : > { %p1691_p5 = pneg %p1690_p3 }
  0x27   : > { %p1698_p12 = pnand %p1697_p9, %p1691_p5 }
  0x29   : > { %1701 = shalt.err (!%p1698_p12)
}
  0x2a   : > { %s2327_s2 = sld [smem:[#allocation30_spill]]  ;;  %s1713_s21 = scalar_lea.vmem %s363_s20, 4096 }
  0x2b   : > { %p1714_p8 = scmp.ne.s32.totalorder %s363_s20, %s1713_s21  ;;  %p1721_p11 = scmp.lt.s32.totalorder %s363_s20, %s363_s20 }
  0x2c   : > { %p1722_p1 = scmp.lt.s32.totalorder %s1713_s21, %s1713_s21 }
  0x2d   : > { %p1716_p4 = pnand %p1714_p8, %p2130_p0 }
  0x2e   : > { %p1723_p3 = por %p1722_p1, %p1721_p11 }
  0x2f   : > { %p1717_p2 = pneg %p1716_p4 }
  0x30   : > { %1497 = dma.hbm_to_vmem [thread:$0]  (!%p2124_p13), %s2327_s2, 128, %s340_s11, [#allocation8]  }
  0x31   : > { %p1724_p10 = pnand %p1723_p3, %p1717_p2 }
  0x33   : > { %1727 = shalt.err (!%p1724_p10)
}
  0x34   : > { %s1980_s25 = smov 256   ;;  %s1981_s17 = smov 16  }
  0x35   : > { %1503 = dma.hbm_to_vmem [thread:$0]  (!%p2124_p13), %s2297_s4, 4096, %s363_s20, [#allocation11], %s1980_s25, %s1980_s25, %s1981_s17  }
  0x36   : > { %s1982_s11 = smov [#allocation4]   ;;  %s1983_s12 = smov [#allocation9]  }
  0x37   : > { %s326_s30 = sshll.u32 %s1982_s11, 4  ;;  %s349_s2 = sshll.u32 %s1983_s12, 4  ;;  %s327_s30 = int_to_ptr.vmem [resolvable:$true] %s326_s30  ;;  %s350_s2 = int_to_ptr.vmem [resolvable:$true] %s349_s2 }
  0x38   : > { %s1739_s26 = scalar_lea.vmem %s327_s30, 64  ;;  %p1747_p10 = scmp.lt.s32.totalorder %s327_s30, %s327_s30 }
  0x39   : > { %p1740_p4 = scmp.ne.s32.totalorder %s327_s30, %s1739_s26  ;;  %p1748_p11 = scmp.lt.s32.totalorder %s1739_s26, %s1739_s26 }
  0x3b   : > { %p1742_p8 = pnand %p1740_p4, %p2130_p0  ;;  %p1749_p5 = por %p1748_p11, %p1747_p10 }
  0x3d   : > { %p1743_p2 = pneg %p1742_p8 }
  0x3f   : > { %p1750_p6 = pnand %p1749_p5, %p1743_p2 }
  0x41   : > { %1753 = shalt.err (!%p1750_p6)
}
  0x42   : > { %1494 = dma.hbm_to_vmem [thread:$0]  (!%p2124_p13), %s2294_s1, 64, %s327_s30, [#allocation5]  }
  0x43   : > { %s1765_s17 = scalar_lea.vmem %s350_s2, 1280  ;;  %p1773_p1 = scmp.lt.s32.totalorder %s350_s2, %s350_s2 }
  0x44   : > { %p1766_p7 = scmp.ne.s32.totalorder %s350_s2, %s1765_s17  ;;  %p1774_p3 = scmp.lt.s32.totalorder %s1765_s17, %s1765_s17 }
  0x46   : > { %p1768_p9 = pnand %p1766_p7, %p2130_p0  ;;  %p1775_p4 = por %p1774_p3, %p1773_p1 }
  0x48   : > { %p1769_p12 = pneg %p1768_p9 }
  0x4a   : > { %p1776_p8 = pnand %p1775_p4, %p1769_p12 }
  0x4c   : > { %1779 = shalt.err (!%p1776_p8)
}
  0x4d   : > { %s1984_s26 = smov 320   ;;  %s1985_s27 = smov 20  }
  0x4e   : > { %1500 = dma.hbm_to_vmem [thread:$0]  (!%p2124_p13), %s2296_s3, 1280, %s350_s2, [#allocation8], %s1984_s26, %s1984_s26, %s1985_s27  }
  0x4f   : > { %s1986_s11 = smov [#allocation12]  }
  0x50   : > { %s378_s30 = sshll.u32 %s1986_s11, 4  ;;  %s379_s30 = int_to_ptr.vmem [resolvable:$true] %s378_s30 }
  0x51   : > { %s1791_s12 = scalar_lea.vmem %s379_s30, 1024  ;;  %p1799_p5 = scmp.lt.s32.totalorder %s379_s30, %s379_s30 }
  0x52   : > { %p1792_p2 = scmp.ne.s32.totalorder %s379_s30, %s1791_s12  ;;  %p1800_p6 = scmp.lt.s32.totalorder %s1791_s12, %s1791_s12 }
  0x54   : > { %p1794_p10 = pnand %p1792_p2, %p2130_p0  ;;  %p1801_p7 = por %p1800_p6, %p1799_p5 }
  0x56   : > { %p1795_p11 = pneg %p1794_p10 }
  0x58   : > { %p1802_p9 = pnand %p1801_p7, %p1795_p11 }
  0x5a   : > { %1805 = shalt.err (!%p1802_p9)
}
  0x5b   : > { %s1987_s21 = smov 64   ;;  %s1988_s15 = smov 4  }
  0x5c   : > { %1506 = dma.hbm_to_vmem [thread:$0]  (!%p2124_p13), %s2299_s6, 1024, %s379_s30, [#allocation11], %s1987_s21, %s1987_s21, %s1988_s15  }
  0x5d   : > { %s1989_s26 = smov [#allocation13]  }
  0x5e   : > { %s392_s27 = sshll.u32 %s1989_s26, 4  ;;  %s393_s27 = int_to_ptr.vmem [resolvable:$true] %s392_s27 }
  0x5f   : > { %s1817_s20 = scalar_lea.vmem %s393_s27, 16  ;;  %s1824_s25 = scalar_lea.vmem %s393_s27, 32 }
  0x60   : > { %p1818_p12 = scmp.ne.s32.totalorder %s393_s27, %s1817_s20  ;;  %p1825_p4 = scmp.lt.s32.totalorder %s393_s27, %s393_s27 }
  0x61   : > { %p1826_p8 = scmp.lt.s32.totalorder %s1824_s25, %s1817_s20 }
  0x62   : > { %p1820_p1 = pnand %p1818_p12, %p2130_p0 }
  0x63   : > { %p1827_p2 = por %p1826_p8, %p1825_p4 }
  0x64   : > { %p1821_p3 = pneg %p1820_p1 }
  0x66   : > { %p1828_p10 = pnand %p1827_p2, %p1821_p3 }
  0x68   : > { %1831 = shalt.err (!%p1828_p10)
}
  0x69   : > { %1509 = dma.hbm_to_vmem [thread:$0]  (!%p2124_p13), %s2300_s7, 16, %s393_s27, [#allocation14]  }
  0x6a   : > { %p2328_p11 = scmp.ne.s32.totalorder %s2323_s28, 0 }
  0x6b   : > { %p2329_p5 = scmp.ne.s32.totalorder (!%p2328_p11), %s2324_s29, 0 }
  0x6c   : > { %415 = sbr.rel (%p2328_p11) target bundleno = 675 (0x2a3), region = 52 }
  0x71   : > { %1931 = dma.done.wait (%p2329_p5), [#allocation5], 64  }
  0x72   : > { %1933 = vsyncadd (%p2329_p5), [#allocation5], 4294967232 }
  0x73   : > { %1935 = dma.done.wait (%p2329_p5), [#allocation8], 1408  }
  0x74   : > { %1937 = vsyncadd (%p2329_p5), [#allocation8], 4294965888 }
  0x75   : > { %1939 = dma.done.wait (%p2329_p5), [#allocation11], 5120  }
  0x76   : > { %1941 = vsyncadd (%p2329_p5), [#allocation11], 4294962176 }
  0x77   : > { %1943 = dma.done.wait (%p2329_p5), [#allocation14], 16  }
  0x78   : > { %1945 = vsyncadd (%p2329_p5), [#allocation14], 4294967280  ;;  %s468_s28 = sand.u32 1, %s1960_s14   ;;  %p475_p13 = scmp.lt.s32.totalorder %s1968_s16, 3 }
  0x79   : > { %s2198_s22 = sshll.u32 %s468_s28, 2  ;;  %p1353_p0 = scmp.ne.s32.totalorder %s1968_s16, 0 }
  0x7a   : > { %s476_s19 = scalar_select %p475_p13, %s1968_s16, 3 }
  0x7b   : > { %s470_s2 = scalar_lea.vmem [#allocation15], %s2198_s22  ;;  %486 = sbr.rel (%p1353_p0) target bundleno = 130 (0x82), region = 80 }
  0x7c   : > { %s1352_s30 = sshll.u32 %s476_s19, 3 }
  0x7d   : > { %s481_s17 = scalar_lea.vmem %s2293_s0, %s1352_s30 }
  0x80   : > { %v487_v0 = vld [vmem:[#allocation4] sm:$0xf]  ;;  %v489_v1 = vld [vmem:[#allocation7] sm:$0xff] }
  0x81   : > { %488 = vst [vmem:[#allocation2] sm:$0xf] %v487_v0  ;;  %490 = vst [vmem:[#allocation3] sm:$0xff] %v489_v1 }
  0x82 PF: > { %v1596_v2 = vld [vmem:[#allocation9 + $0x2c] ss:$20 sps:$4 sm:$0xff]   ;;  %v1598_v3 = vld [vmem:[#allocation10 + $0xe4] ss:$16 sps:$4 sm:$0xff]   ;;  %v1990_v4 = vmov 0   ;;  %vm559_vm0 = vcmask 261120  }
  0x83   : > { %595 = vmatprep.mubr.bf16.mxu0 %v1990_v4  ;;  %909 = vmatprep.mubr.bf16.mxu1 %v1990_v4  ;;  %v1600_v5 = vld [vmem:[#allocation9 + $0x28] ss:$20 sps:$4 sm:$0xff]   ;;  %v1601_v6 = vld [vmem:[#allocation10 + $0xe0] ss:$16 sps:$4 sm:$0xff]   ;;  %v1602_v7 = vld [vmem:[#allocation9 + $0x4] ss:$20 sps:$4 sm:$0xff]  }
  0x84   : > { %575 = vmatprep.subr.bf16.mxu0 %v1596_v2  ;;  %877 = vmatprep.subr.bf16.mxu1 %v1598_v3  ;;  %v1604_v8 = vld [vmem:[#allocation10 + $0xc4] ss:$16 sps:$4 sm:$0xff]   ;;  %v1607_v10 = vld [vmem:[#allocation10 + $0xc0] ss:$16 sps:$4 sm:$0xff]   ;;  %v491_v11 = vld [vmem:[%s481_s17] sm:$0xff]  ;;  %v1991_v24 = vmov 0.0  }
  0x85   : > { %576 = vmatpush1.bf16.msra.mxu0 %v1600_v5  ;;  %878 = vmatpush1.bf16.msra.mxu1 %v1601_v6  ;;  %v1606_v9 = vld [vmem:[#allocation9] ss:$20 sps:$4 sm:$0xff]   ;;  %v1608_v12 = vld [vmem:[#allocation9 + $0x30] ss:$20 sps:$4 sm:$0xff]   ;;  %v494_v14 = vpack.c.bf16 %v491_v11, %v491_v11  ;;  %v1614_v19 = vld [vmem:[#allocation9 + $0x8] ss:$20 sps:$4 sm:$0xff]  }
  0x86   : > { %577 = vmatprep.subr.bf16.mxu0 %v1602_v7  ;;  %879 = vmatprep.subr.bf16.mxu1 %v1604_v8  ;;  %v1610_v13 = vld [vmem:[#allocation9 + $0x34] ss:$20 sps:$4 sm:$0xff]   ;;  %v1613_v16 = vld [vmem:[#allocation10 + $0xa0] ss:$16 sps:$4 sm:$0xff]   ;;  %v1622_v22 = vld [vmem:[#allocation9 + $0x38] ss:$20 sps:$4 sm:$0xff]  }
  0x87   : > { %v1611_v15 = vld [vmem:[#allocation10 + $0xa4] ss:$16 sps:$4 sm:$0xff]   ;;  %v1616_v17 = vld [vmem:[#allocation9 + $0xc] ss:$20 sps:$4 sm:$0xff]   ;;  %vm1992_vm1 = vmmov 0   ;;  %v1660_v51 = vld [vmem:[#allocation12 + $0x28] sm:$0xff]  }
  0x88   : > { %v1617_v18 = vld [vmem:[#allocation10 + $0x84] ss:$16 sps:$4 sm:$0xff]   ;;  %v1619_v20 = vld [vmem:[#allocation10 + $0x80] ss:$16 sps:$4 sm:$0xff]   ;;  %v1632_v29 = vld [vmem:[#allocation10 + $0xec] ss:$16 sps:$4 sm:$0xff]  }
  0x89   : > { %578 = vmatpush1.bf16.msra.mxu0 %v1606_v9  ;;  %880 = vmatpush1.bf16.msra.mxu1 %v1607_v10  ;;  %v1620_v21 = vld [vmem:[#allocation10 + $0x64] ss:$16 sps:$4 sm:$0xff]   ;;  %v1623_v23 = vld [vmem:[#allocation10 + $0x60] ss:$16 sps:$4 sm:$0xff]   ;;  %v1630_v30 = vld [vmem:[#allocation10 + $0xe8] ss:$16 sps:$4 sm:$0xff]  }
  0x8a   : > { %616 = vmatprep.subr.bf16.mxu0 %v1610_v13  ;;  %881 = vmatprep.subr.bf16.mxu1 %v1611_v15  ;;  %v1624_v25 = vld [vmem:[#allocation10 + $0x44] ss:$16 sps:$4 sm:$0xff]   ;;  %v1627_v27 = vld [vmem:[#allocation10 + $0x40] ss:$16 sps:$4 sm:$0xff]   ;;  %v1638_v33 = vld [vmem:[#allocation10 + $0xcc] ss:$16 sps:$4 sm:$0xff]  }
  0x8b   : > { %v1626_v26 = vld [vmem:[#allocation9 + $0x10] ss:$20 sps:$4 sm:$0xff]   ;;  %v1636_v34 = vld [vmem:[#allocation10 + $0xc8] ss:$16 sps:$4 sm:$0xff]   ;;  %v1642_v36 = vld [vmem:[#allocation10 + $0xac] ss:$16 sps:$4 sm:$0xff]  }
  0x8c   : > { %1364 = vmatmul.mubr.msk.bf16.vlgmr.msra.gmra.mxu0 %vm559_vm0, %v494_v14  ;;  %v1628_v28 = vld [vmem:[#allocation10 + $0x24] ss:$16 sps:$4 sm:$0xff]   ;;  %v1633_v31 = vld [vmem:[#allocation10 + $0x20] ss:$16 sps:$4 sm:$0xff]   ;;  %v492_v37 = vld [vmem:[#allocation2] sm:$0xf] }
  0x8d   : > { %617 = vmatpush1.bf16.msra.mxu0 %v1608_v12  ;;  %882 = vmatpush1.bf16.msra.mxu1 %v1613_v16  ;;  %v1634_v32 = vld [vmem:[#allocation10 + $0x4] ss:$16 sps:$4 sm:$0xff]   ;;  %v1639_v35 = vld [vmem:[#allocation10] ss:$16 sps:$4 sm:$0xff]   ;;  %v1640_v38 = vld [vmem:[#allocation10 + $0xa8] ss:$16 sps:$4 sm:$0xff]  }
  0x8e   : > { %618 = vmatprep.subr.bf16.mxu0 %v1616_v17  ;;  %883 = vmatprep.subr.bf16.mxu1 %v1617_v18  ;;  %v1645_v39 = vld [vmem:[#allocation10 + $0x8c] ss:$16 sps:$4 sm:$0xff]   ;;  %v1643_v40 = vld [vmem:[#allocation10 + $0x88] ss:$16 sps:$4 sm:$0xff]   ;;  %v1659_v50 = vld [vmem:[#allocation12 + $0x30] sm:$0xff]   ;;  %p1408_p6 = scmp.ne.s32.totalorder %s1968_s16, 3 }
  0x8f   : > { %636 = vmatprep.mubr.bf16.mxu0 %v1990_v4  ;;  %v1648_v41 = vld [vmem:[#allocation10 + $0x6c] ss:$16 sps:$4 sm:$0xff]   ;;  %v1646_v42 = vld [vmem:[#allocation10 + $0x68] ss:$16 sps:$4 sm:$0xff]   ;;  %v1661_v52 = vld [vmem:[#allocation12 + $0x20] sm:$0xff]  }
  0x90   : > { %v1651_v43 = vld [vmem:[#allocation10 + $0x4c] ss:$16 sps:$4 sm:$0xff]   ;;  %v1649_v44 = vld [vmem:[#allocation10 + $0x48] ss:$16 sps:$4 sm:$0xff]   ;;  %v1663_v54 = vld [vmem:[#allocation12 + $0x10] sm:$0xff]  }
  0x91   : > { %619 = vmatpush1.bf16.msra.mxu0 %v1614_v19  ;;  %884 = vmatpush1.bf16.msra.mxu1 %v1619_v20  ;;  %v1654_v45 = vld [vmem:[#allocation10 + $0x2c] ss:$16 sps:$4 sm:$0xff]   ;;  %v1652_v46 = vld [vmem:[#allocation10 + $0x28] ss:$16 sps:$4 sm:$0xff]   ;;  %v1665_v56 = vld [vmem:[#allocation12] sm:$0xff]  }
  0x92   : > { %1429 = vmatprep.subr.bf16.mxu0 %v1991_v24  ;;  %885 = vmatprep.subr.bf16.mxu1 %v1620_v21  ;;  %v1657_v47 = vld [vmem:[#allocation10 + $0xc] ss:$16 sps:$4 sm:$0xff]   ;;  %v1655_v48 = vld [vmem:[#allocation10 + $0x8] ss:$16 sps:$4 sm:$0xff]  }
  0x93   : > { %v1658_v49 = vld [vmem:[#allocation12 + $0x38] sm:$0xff]   ;;  %v1664_v55 = vld [vmem:[#allocation12 + $0x8] sm:$0xff]  }
  0x94   : > { %1365 = vmatmul.mubr.msk.bf16.vlgmr.msra.gmra.mxu0 %vm559_vm0, %v494_v14  ;;  %v1662_v53 = vld [vmem:[#allocation12 + $0x18] sm:$0xff]  }
  0x95   : > { %1430 = vmatpush3.bf16.msra.mxu0 %v1622_v22  ;;  %886 = vmatpush1.bf16.msra.mxu1 %v1623_v23  ;;  %v963_v12 = vld [vmem:[%s2298_s5] sm:$0xf] }
  0x96   : > { %1431 = vmatprep.subr.bf16.mxu0 %v1991_v24  ;;  %887 = vmatprep.subr.bf16.mxu1 %v1624_v25 }
  0x97   : > { %1433 = vmatprep.mubr.msk.bf16.mxu0 %vm1992_vm1, %v1991_v24 }
  0x99   : > { %1432 = vmatpush3.bf16.msra.mxu0 %v1626_v26  ;;  %888 = vmatpush1.bf16.msra.mxu1 %v1627_v27 }
  0x9a   : > { %889 = vmatprep.subr.bf16.mxu1 %v1628_v28  ;;  %918 = vmatprep.subr.bf16.mxu0 %v1632_v29 }
  0x9c   : > { %1434 = vmatmul.mubr.msk.bf16.vlgmr.msra.gmra.mxu0 %vm559_vm0, %v494_v14 }
  0x9d   : > { %890 = vmatpush1.bf16.msra.mxu1 %v1633_v31  ;;  %919 = vmatpush1.bf16.msra.mxu0 %v1630_v30 }
  0x9e   : > { %891 = vmatprep.subr.bf16.mxu1 %v1634_v32  ;;  %920 = vmatprep.subr.bf16.mxu0 %v1638_v33 }
  0x9f   : > { %950 = vmatprep.mubr.bf16.mxu0 %v1990_v4  ;;  %v965_v4 = vlaneseq }
  0xa1   : > { %892 = vmatpush1.bf16.msra.mxu1 %v1639_v35  ;;  %921 = vmatpush1.bf16.msra.mxu0 %v1636_v34  ;;  %v966_v7 = vshrl.u32 %v965_v4, 7 }
  0xa2   : > { %922 = vmatprep.subr.bf16.mxu0 %v1642_v36  ;;  %1437 = vmatprep.subr.bf16.mxu1 %v1991_v24 }
  0xa3   : > { %v971_v9 = vsub.s32 1, %v966_v7  ;;  %v967_v11 = vsub.s32 0, %v966_v7  ;;  %v975_v22 = vsub.s32 2, %v966_v7 }
  0xa4   : > { %910 = vmatmul.mubr.bf16.vlgmr.msra.gmra.mxu1 %v492_v37 }
  0xa5   : > { %923 = vmatpush1.bf16.msra.mxu0 %v1640_v38  ;;  %1453 = vmatprep.mubr.msk.bf16.mxu1 %vm1992_vm1, %v1991_v24  ;;  %v972_v15 = vrot.slane %v963_v12, %v971_v9  ;;  %v968_v17 = vrot.slane %v963_v12, %v967_v11  ;;  %v976_v23 = vrot.slane %v963_v12, %v975_v22 }
  0xa6   : > { %924 = vmatprep.subr.bf16.mxu0 %v1645_v39  ;;  %1438 = vmatpush3.bf16.msra.mxu1 %v1658_v49 }
  0xa7   : > { %1439 = vmatprep.subr.bf16.mxu1 %v1991_v24 }
  0xa9   : > { %925 = vmatpush1.bf16.msra.mxu0 %v1643_v40  ;;  %v493_v40 = vld [vmem:[#allocation3] sm:$0xff] }
  0xaa   : > { %926 = vmatprep.subr.bf16.mxu0 %v1648_v41  ;;  %1440 = vmatpush3.bf16.msra.mxu1 %v1659_v50 }
  0xab   : > { %1441 = vmatprep.subr.bf16.mxu1 %v1991_v24 }
  0xad   : > { %927 = vmatpush1.bf16.msra.mxu0 %v1646_v42 }
  0xae   : > { %928 = vmatprep.subr.bf16.mxu0 %v1651_v43  ;;  %1442 = vmatpush3.bf16.msra.mxu1 %v1660_v51 }
  0xaf   : > { %1443 = vmatprep.subr.bf16.mxu1 %v1991_v24 }
  0xb1   : > { %929 = vmatpush1.bf16.msra.mxu0 %v1649_v44 }
  0xb2   : > { %930 = vmatprep.subr.bf16.mxu0 %v1654_v45  ;;  %1444 = vmatpush3.bf16.msra.mxu1 %v1661_v52 }
  0xb3   : > { %1445 = vmatprep.subr.bf16.mxu1 %v1991_v24 }
  0xb5   : > { %931 = vmatpush1.bf16.msra.mxu0 %v1652_v46 }
  0xb6   : > { %932 = vmatprep.subr.bf16.mxu0 %v1657_v47  ;;  %1446 = vmatpush3.bf16.msra.mxu1 %v1662_v53  ;;  %v1407_v53 = vld [vmem:[#allocation13] ss:$0 sm:$0xff] }
  0xb7   : > { %1447 = vmatprep.subr.bf16.mxu1 %v1991_v24 }
  0xb9   : > { %933 = vmatpush1.bf16.msra.mxu0 %v1655_v48 }
  0xba   : > { %1448 = vmatpush3.bf16.msra.mxu1 %v1663_v54 }
  0xbb   : > { %1449 = vmatprep.subr.bf16.mxu1 %v1991_v24 }
  0xbc   : > { %951 = vmatmul.mubr.bf16.vlgmr.msra.gmra.mxu0 %v492_v37 }
  0xbe   : > { %1450 = vmatpush3.bf16.msra.mxu1 %v1664_v55 }
  0xbf   : > { %1451 = vmatprep.subr.bf16.mxu1 %v1991_v24  ;;  %v979_v24 = vsub.s32 3, %v966_v7 }
  0xc1   : > { %v980_v30 = vrot.slane %v963_v12, %v979_v24 }
  0xc2   : > { %1452 = vmatpush3.bf16.msra.mxu1 %v1665_v56 }
 0x14c   : > { %v597_v57 = vpop.f32.mrf.mxu0 }
 0x14e   : > { %v599_v58 = vpop.f32.mrf.mxu0 }
 0x150   : > { %v601_v59 = vpop.f32.mrf.mxu0 }
 0x152   : > { %v602_v60 = vpop.f32.mrf.mxu0 }
 0x154   : > { %v638_v61 = vpop.f32.mrf.mxu0 }
 0x156   : > { %v640_v62 = vpop.f32.mrf.mxu0 }
 0x158   : > { %v642_v63 = vpop.f32.mrf.mxu0 }
 0x15a   : > { %v643_v0 = vpop.f32.mrf.mxu0 }
 0x15c   : > { %v679_v1 = vpop.f32.mrf.mxu0 }
 0x15e   : > { %v1435_v2 = vpop.f32.mrf.mxu0 }
 0x160   : > { %v682_v3 = vpop.f32.mrf.mxu0 }
 0x162   : > { %v1436_v5 = vpop.f32.mrf.mxu0 }
 0x164   : > { %v911_v6 = vpop.f32.mrf.mxu1 }
 0x165   : > { %v959_v16 = vadd.f32 %v911_v6, %v597_v57 }
 0x166   : > { %v913_v8 = vpop.f32.mrf.mxu1 }
 0x167   : > { %v960_v14 = vadd.f32 %v913_v8, %v599_v58  ;;  %v985_v19 = vadd.f32 %v968_v17, %v959_v16 }
 0x168   : > { %v915_v10 = vpop.f32.mrf.mxu1 }
 0x169   : > { %v986_v18 = vadd.f32 %v972_v15, %v960_v14  ;;  %v989_v21 = vmul.f32 0.5, %v985_v19 }
 0x16a   : > { %v916_v13 = vpop.f32.mrf.mxu1 }
 0x16b   : > { %v993_v20 = vmul.f32 0.5, %v986_v18 }
 0x16d   : > { %1666 = vtanh.f32 %v993_v20 }
 0x16e   : > { %1668 = vtanh.f32 %v989_v21 }
 0x17a   : > { %v1667_v34 = vpop.eup %1666 }
 0x17b   : > { %v1669_v35 = vpop.eup %1668  ;;  %v995_v36 = vmul.f32 0.5, %v1667_v34 }
 0x17c   : > { %v952_v25 = vpop.f32.mrf.mxu0  ;;  %v991_v38 = vmul.f32 0.5, %v1669_v35 }
 0x17d   : > { %v961_v26 = vadd.f32 %v952_v25, %v638_v61  ;;  %v996_v39 = vadd.f32 0.5, %v995_v36 }
 0x17e   : > { %v954_v27 = vpop.f32.mrf.mxu0  ;;  %v992_v41 = vadd.f32 0.5, %v991_v38 }
 0x17f   : > { %v987_v28 = vadd.f32 %v976_v23, %v961_v26  ;;  %v962_v29 = vadd.f32 %v954_v27, %v640_v62  ;;  %v1002_v43 = vmul.f32 %v996_v39, %v493_v40 }
 0x180   : > { %v956_v31 = vpop.f32.mrf.mxu0 }
 0x181   : > { %1670 = vtanh.f32 %v987_v28  ;;  %v988_v33 = vadd.f32 %v980_v30, %v962_v29 }
 0x182   : > { %v957_v32 = vpop.f32.mrf.mxu0 }
 0x183   : > { %v998_v37 = vmul.f32 0.5, %v988_v33 }
 0x185   : > { %1672 = vtanh.f32 %v998_v37 }
 0x18e   : > { %v1671_v42 = vpop.eup %1670 }
 0x18f   : > { %v1003_v44 = vmul.f32 %v1671_v42, %v992_v41 }
 0x191   : > { %v1004_v45 = vadd.f32 %v1003_v44, %v1002_v43 }
 0x192   : > { %v1673_v46 = vpop.eup %1672 }
 0x193   : > { %1674 = vtanh.f32 %v1004_v45  ;;  %1124 = vst [vmem:[#allocation3] sm:$0xff] %v1004_v45  ;;  %v1000_v47 = vmul.f32 0.5, %v1673_v46 }
 0x195   : > { %v1001_v48 = vadd.f32 0.5, %v1000_v47 }
 0x1a0   : > { %v1675_v49 = vpop.eup %1674 }
 0x1a1   : > { %v1006_v50 = vmul.f32 %v1675_v49, %v1001_v48 }
 0x1a3   : > { %v1007_v51 = vpack.c.bf16 %v1006_v50, %v1006_v50 }
 0x1a5   : > { %1454 = vmatmul.mubr.bf16.vlgmr.msra.gmra.mxu1 %v1007_v51  ;;  %1123 = vst [vmem:[#allocation2] sm:$0xf] %v1007_v51 }
 0x265   : > { %v1106_v52 = vpop.f32.mrf.mxu1 }
 0x266   : > { %v1112_v54 = vadd.f32 %v1106_v52, %v679_v1 }
 0x267   : > { %v1455_v55 = vpop.f32.mrf.mxu1 }
 0x268   : > { %v1120_v56 = vadd.f32 %v1407_v53, %v1112_v54  ;;  %1128 = sbr.rel (%p1408_p6) target bundleno = 623 (0x26f), region = 84 }
 0x269   : > { %v1109_v57 = vpop.f32.mrf.mxu1 }
 0x26a   : > { %v1121_v58 = vpack.c.bf16 %v1120_v56, %v1120_v56 }
 0x26b   : > { %v1456_v59 = vpop.f32.mrf.mxu1 }
 0x26c   : > { %1122 = vst [vmem:[%s470_s2] sm:$0xf] %v1121_v58 }
 0x26d   : > { %v1129_v60 = vld [vmem:[#allocation2] sm:$0xf]  ;;  %v1131_v61 = vld [vmem:[#allocation3] sm:$0xff] }
 0x26e   : > { %1130 = vst [vmem:[#allocation16] sm:$0xf] %v1129_v60  ;;  %1132 = vst [vmem:[#allocation18] sm:$0xff] %v1131_v61 }
 0x26f PF: > { %s1993_s27 = smov [#allocation16]   ;;  %s1410_s25 = sshll.u32 %s1968_s16, 6 }
 0x270   : > { %s1161_s20 = sshll.u32 %s1993_s27, 4  ;;  %p2330_p9 = scmp.ne.s32.totalorder %s2317_s23, 0  ;;  %s1162_s20 = int_to_ptr.vmem [resolvable:$true] %s1161_s20 }
 0x271   : > { %s1832_s11 = scalar_lea.vmem %s1162_s20, 64  ;;  %p1839_p3 = scmp.lt.s32.totalorder %s1162_s20, %s1162_s20 }
 0x272   : > { %p1833_p7 = scmp.ne.s32.totalorder %s1162_s20, %s1832_s11  ;;  %p1840_p4 = scmp.lt.s32.totalorder %s1832_s11, %s1832_s11 }
 0x274   : > { %p1834_p12 = pnand %p1833_p7, %p2330_p9  ;;  %p1841_p8 = por %p1840_p4, %p1839_p3 }
 0x276   : > { %p1835_p1 = pneg %p1834_p12 }
 0x278   : > { %p1842_p2 = pnand %p1841_p8, %p1835_p1 }
 0x27a   : > { %1845 = shalt.err (!%p1842_p2)
}
 0x27b   : > { %1483 = dma.vmem_to_hbm [thread:$0]  (%p2330_p9), %s1162_s20, 64, %s2302_s9, [#allocation17]  }
 0x27c   : > { %s1146_s21 = scalar_lea.hbm %s2301_s8, %s1410_s25  ;;  %s1148_s15 = sshll.u32 %s470_s2, 4  ;;  %s1149_s15 = int_to_ptr.vmem [resolvable:$true] %s1148_s15 }
 0x27d   : > { %s1134_s17 = scalar_lea.sflag [#allocation6], %s468_s28  ;;  %s1856_s29 = scalar_lea.vmem %s1149_s15, 64 }
 0x27e   : > { %p1857_p10 = scmp.ne.s32.totalorder %s1149_s15, %s1856_s29  ;;  %p2331_p11 = scmp.ne.s32.totalorder %s2319_s24, 0 }
 0x27f   : > { %s1994_s26 = smov [#allocation15]  }
 0x280   : > { %p1858_p5 = pnand %p1857_p10, %p2331_p11  ;;  %s1860_s27 = sshll.u32 %s1994_s26, 4  ;;  %s1861_s27 = int_to_ptr.vmem [resolvable:$false] %s1860_s27 }
 0x281   : > { %s1862_s11 = scalar_lea.vmem %s1861_s27, 128  ;;  %p1863_p0 = scmp.lt.s32.totalorder %s1149_s15, %s1861_s27 }
 0x282   : > { %p1859_p13 = pneg %p1858_p5  ;;  %p1864_p6 = scmp.lt.s32.totalorder %s1862_s11, %s1856_s29 }
 0x284   : > { %p1865_p7 = por %p1864_p6, %p1863_p0 }
 0x286   : > { %p1866_p12 = pnand %p1865_p7, %p1859_p13 }
 0x288   : > { %1869 = shalt.err (!%p1866_p12)
}
 0x289   : > { %s1870_s20 = scalar_lea.hbm %s1146_s21, 64  ;;  %s1874_s2 = scalar_lea.hbm %s2301_s8, 256 }
 0x28a   : > { %p1871_p1 = scmp.ne.s32.totalorder %s1146_s21, %s1870_s20  ;;  %p1875_p8 = scmp.lt.s32.totalorder %s1146_s21, %s2301_s8 }
 0x28b   : > { %p1876_p2 = scmp.lt.s32.totalorder %s1874_s2, %s1870_s20 }
 0x28c   : > { %p1872_p3 = pnand %p1871_p1, %p2331_p11 }
 0x28d   : > { %p1877_p10 = por %p1876_p2, %p1875_p8 }
 0x28e   : > { %p1873_p4 = pneg %p1872_p3 }
 0x290   : > { %p1878_p5 = pnand %p1877_p10, %p1873_p4 }
 0x292   : > { %1881 = shalt.err (!%p1878_p5)
}
 0x293   : > { %1481 = dma.vmem_to_hbm [thread:$0]  (%p2331_p11), %s1149_s15, 64, %s1146_s21, %s1134_s17  }
 0x294   : > { %s1995_s19 = smov [#allocation18]  }
 0x295   : > { %s1174_s16 = sshll.u32 %s1995_s19, 4  ;;  %s1175_s16 = int_to_ptr.vmem [resolvable:$true] %s1174_s16 }
 0x296   : > { %s1882_s30 = scalar_lea.vmem %s1175_s16, 128  ;;  %p1889_p7 = scmp.lt.s32.totalorder %s1175_s16, %s1175_s16 }
 0x297   : > { %p1883_p13 = scmp.ne.s32.totalorder %s1175_s16, %s1882_s30  ;;  %p1890_p12 = scmp.lt.s32.totalorder %s1882_s30, %s1882_s30 }
 0x299   : > { %p1884_p0 = pnand %p1883_p13, %p2330_p9  ;;  %p1891_p1 = por %p1890_p12, %p1889_p7 }
 0x29b   : > { %p1885_p6 = pneg %p1884_p0 }
 0x29d   : > { %p1892_p3 = pnand %p1891_p1, %p1885_p6 }
 0x29f   : > { %1895 = shalt.err (!%p1892_p3)
}
 0x2a0   : > { %1485 = dma.vmem_to_hbm [thread:$0]  (%p2330_p9), %s1175_s16, 128, %s2303_s10, [#allocation17]  }
 0x2a1   : > { %1947 = dma.done.wait (%p2330_p9), [#allocation17], 192  }
 0x2a2   : > { %1949 = vsyncadd (%p2330_p9), [#allocation17], 4294967104 }
 0x2a3 PF: > { %s2332_s24 = sld [smem:[#allocation28_spill]]  ;;  %p1530_p11 = scmp.ge.s32.totalorder %s1976_s18, 2 }
 0x2a4   : > { %s1194_s21 = sand.u32 1, %s1956_s13  }
 0x2a5   : > { %s1195_s15 = scalar_lea.sflag [#allocation6], %s1194_s21 }
 0x2a9   : > { %p2333_p4 = scmp.ne.s32.totalorder %s2332_s24, 0 }
 0x2ab   : > { %p1511_p8 = pnand %p1530_p11, %p2333_p4 }
 0x2ad   : > { %p1512_p2 = pneg %p1511_p8 }
 0x2af   : > { %1951 = dma.done.wait (%p1512_p2), %s1195_s15, 64  }
 0x2b0   : > { %1953 = vsyncadd (%p1512_p2), %s1195_s15, 4294967232  ;;  %s29_s18 = sadd.s32 1, %s1976_s18   ;;  %s2334_s17 = sld [smem:[#allocation25_spill]] }
 0x2b1   : > { %p26_p10 = scmp.ge.s32.totalorder %s29_s18, 6   ;;  %s2335_s15 = sld [smem:[#allocation29_spill]] }
 0x2b2   : > { %s2336_s16 = sld [smem:[#allocation26_spill]]  ;;  %s2338_s13 = smov %s1960_s14 }
 0x2b3   : > { %s2337_s23 = sld [smem:[#allocation27_spill]] }
 0x2b5   :  { %28 = sbr.rel (!%p26_p10) target bundleno = 11 (0xb), region = 140 }
 0x2b6   : > { %s2339_s14 = smov %s2334_s17 }
 0x2b9   : > { %s2340_s17 = smov %s2337_s23 }
 0x2ba   :  { %1200 = vsyncpa [#allocation5], 1 }
 0x2bb   :  { %1202 = vsyncpa [#allocation5 + $0x1], 1 }
 0x2bc   :  { %1203 = vsyncpa [#allocation8], 1 }
 0x2bd   :  { %1204 = vsyncpa [#allocation11], 1 }
 0x2be   :  { %1205 = vsyncpa [#allocation14], 1 }
 0x2bf   :  { %1206 = vsyncpa [#allocation6], 1 }
 0x2c0   :  { %1208 = vsyncpa [#allocation6 + $0x1], 1 }
 0x2c1   :  { %1209 = vsyncpa [#allocation17], 1 }

</bundles_post_ra>
